<compile_context>
chip_gen: v5e
topology: v5e:2x2
jax: 0.10.0
libtpu: 0.0.40
codegen_flags: <defaults>
</compile_context>

<pallas_src>
import jax
import jax.numpy as jnp
from jax.experimental import pallas as pl
from jax.experimental.pallas import tpu as pltpu


def _round_up(x: int, m: int) -> int:
    return (x + m - 1) // m * m


def _matrix_scaling_kernel(b_ref, x_ref, w_ref, o_ref, acc_ref):
    # b_ref: scalar bias in SMEM; x/w/o: VMEM tiles; acc_ref: f32 VMEM accumulator.
    k = pl.program_id(2)

    @pl.when(k == 0)
    def _():
        acc_ref[...] = jnp.zeros_like(acc_ref)

    acc_ref[...] += jnp.dot(
        x_ref[...], w_ref[...], preferred_element_type=jnp.float32
    )

    @pl.when(k == pl.num_programs(2) - 1)
    def _():
        o_ref[...] = (acc_ref[...] + b_ref[0]).astype(o_ref.dtype)


def matrix_scaling(logits: jax.Array, W: jax.Array, b: jax.Array) -> jax.Array:
    """logits: (B, C) float32, W: (C, C) float32, b: (1,) float32."""
    B, C = logits.shape
    assert W.shape == (C, C)
    assert b.shape == (1,)

    # ---- Tile-size / padding selection -------------------------------------
    # Class (lane) dimension: pad to a multiple of 128 for lane-dense stores.
    # 256-aligned tiles match the v6e/v7x MXU; 256 is also a multiple of 128
    # (v5e MXU) so the same choice is safe on all generations.
    if C <= 256:
        c_pad = _round_up(C, 128)
        tn = tk = c_pad                    # single N/K block
    else:
        tn = tk = 256
        c_pad = _round_up(C, 256)

    # Batch (sublane) dimension: multiple of 8 for f32 sublanes; cap TM at 256
    # so 2x double-buffered (TM, TK) + (TM, TN) tiles stay far under the 32 MiB
    # scoped VMEM default (also fine on v7x's 64 MiB physical VMEM).
    if B <= 256:
        tm = _round_up(B, 8)
        b_rows = tm
    else:
        tm = 256
        b_rows = _round_up(B, 256)

    # Zero padding: extra logits columns are zero and extra W rows are zero, so
    # padded K contributes nothing; padded output rows/cols are sliced off.
    x = logits
    if (b_rows, c_pad) != (B, C):
        x = jnp.pad(logits, ((0, b_rows - B), (0, c_pad - C)))
    w = W
    if c_pad != C:
        w = jnp.pad(W, ((0, c_pad - C), (0, c_pad - C)))

    grid = (b_rows // tm, c_pad // tn, c_pad // tk)

    out_padded = pl.pallas_call(
        _matrix_scaling_kernel,
        out_shape=jax.ShapeDtypeStruct((b_rows, c_pad), logits.dtype),
        grid_spec=pltpu.PrefetchScalarGridSpec(
            num_scalar_prefetch=0,
            grid=grid,
            in_specs=[
                # scalar bias -> SMEM (whole array, no tiling)
                pl.BlockSpec(memory_space=pltpu.SMEM),
                # logits tile (TM, TK) at block (i, k)
                pl.BlockSpec((tm, tk), lambda i, j, k: (i, k)),
                # weight tile (TK, TN) at block (k, j) -- stays resident in VMEM
                # across the batch axis when grid[1] == grid[2] == 1.
                pl.BlockSpec((tk, tn), lambda i, j, k: (k, j)),
            ],
            out_specs=pl.BlockSpec((tm, tn), lambda i, j, k: (i, j)),
            scratch_shapes=[pltpu.VMEM((tm, tn), jnp.float32)],
        ),
        compiler_params=pltpu.CompilerParams(
            # M/N tiles are independent (each output tile written exactly once)
            # -> "parallel" enables megacore sharding on v7x; K is a reduction.
            dimension_semantics=("parallel", "parallel", "arbitrary"),
        ),
        cost_estimate=pl.CostEstimate(
            flops=2 * b_rows * c_pad * c_pad,
            bytes_accessed=4 * (2 * b_rows * c_pad + c_pad * c_pad),
            transcendentals=0,
        ),
    )(b, x, w)

    if (b_rows, c_pad) != (B, C):
        return out_padded[:B, :C]
    return out_padded


if __name__ == "__main__":
    key = jax.random.PRNGKey(0)

    # ---- Test 1: the module's init (W = I, b = 0), small shapes ------------
    num_classes = 32
    batch = 8
    W = jnp.eye(num_classes, dtype=jnp.float32)
    b = jnp.zeros((1,), dtype=jnp.float32)

    k1, k2, k3, k4 = jax.random.split(key, 4)
    logits = jax.random.normal(k1, (batch, num_classes), dtype=jnp.float32)

    out = matrix_scaling(logits, W, b)
    out = jax.block_until_ready(out)
    ref = jnp.matmul(logits, W) + b
    assert out.shape == (batch, num_classes)
    assert jnp.allclose(out, ref, atol=1e-5), "mismatch vs reference (identity W)"

    # ---- Test 2: non-trivial W/b with K/N tiling exercised (C > 256) -------
    num_classes2 = 320
    batch2 = 40
    W2 = jax.random.normal(k2, (num_classes2, num_classes2), dtype=jnp.float32)
    b2 = jax.random.normal(k3, (1,), dtype=jnp.float32)
    logits2 = jax.random.normal(k4, (batch2, num_classes2), dtype=jnp.float32)

    out2 = matrix_scaling(logits2, W2, b2)
    out2 = jax.block_until_ready(out2)
    ref2 = jnp.matmul(logits2, W2) + b2
    assert out2.shape == (batch2, num_classes2)
    assert jnp.allclose(out2, ref2, atol=1e-3, rtol=1e-4), "mismatch vs reference (tiled)"

    print("KERNEL_OK")
</pallas_src>

<mosaic_0001>
module attributes {stable_mosaic.version = 11 : i64} {
  func.func @_matrix_scaling_kernel(%arg0: i32, %arg1: i32, %arg2: i32, %arg3: memref<1xf32, #tpu.memory_space<smem>>, %arg4: memref<8x128xf32, #tpu.memory_space<vmem>>, %arg5: memref<128x128xf32, #tpu.memory_space<vmem>>, %arg6: memref<8x128xf32, #tpu.memory_space<vmem>>, %arg7: memref<8x128xf32, #tpu.memory_space<vmem>>) attributes {dimension_semantics = [#tpu.dimension_semantics<parallel>, #tpu.dimension_semantics<parallel>, #tpu.dimension_semantics<arbitrary>], iteration_bounds = array<i64: 1, 1, 1>, scalar_prefetch = 0 : i64, scratch_operands = 1 : i64, tpu.core_type = #tpu.core_type<tc>, window_params = [{transform_indices = @transform_0, window_bounds = array<i64: 1>}, {transform_indices = @transform_1, window_bounds = array<i64: 8, 128>}, {transform_indices = @transform_2, window_bounds = array<i64: 128, 128>}, {transform_indices = @transform_3, window_bounds = array<i64: 8, 128>}]} {
    %c0_i32 = arith.constant 0 : i32
    %0 = arith.cmpi eq, %arg2, %c0_i32 : i32
    %1 = arith.extui %0 : i1 to i32
    %c0_i32_0 = arith.constant 0 : i32
    %2 = arith.cmpi ne, %1, %c0_i32_0 : i32
    scf.if %2 {
      %cst_10 = arith.constant 0.000000e+00 : f32
      %12 = vector.broadcast %cst_10 : f32 to vector<8x128xf32>
      %c0_11 = arith.constant 0 : index
      %c0_12 = arith.constant 0 : index
      %13 = vector.load %arg7[%c0_11, %c0_12] : memref<8x128xf32, #tpu.memory_space<vmem>>, vector<8x128xf32>
      tpu.vector_store %arg7[%c0_11, %c0_12], %12 {strides = array<i32>} : memref<8x128xf32, #tpu.memory_space<vmem>>, vector<8x128xf32>,
    } else {
    }
    %c0 = arith.constant 0 : index
    %c0_1 = arith.constant 0 : index
    %3 = vector.load %arg7[%c0, %c0_1] : memref<8x128xf32, #tpu.memory_space<vmem>>, vector<8x128xf32>
    %c0_2 = arith.constant 0 : index
    %c0_3 = arith.constant 0 : index
    %4 = vector.load %arg4[%c0_2, %c0_3] : memref<8x128xf32, #tpu.memory_space<vmem>>, vector<8x128xf32>
    %c0_4 = arith.constant 0 : index
    %c0_5 = arith.constant 0 : index
    %5 = vector.load %arg5[%c0_4, %c0_5] : memref<128x128xf32, #tpu.memory_space<vmem>>, vector<128x128xf32>
    %cst = arith.constant dense<0.000000e+00> : vector<8x128xf32>
    %6 = tpu.matmul %4, %5, %cst {dimension_numbers = #tpu.dot_dimension_numbers<[1], [0], [0], [1], [0, 0, 1, 1], [], []>} : vector<8x128xf32>, vector<128x128xf32>, vector<8x128xf32> -> vector<8x128xf32>
    %7 = arith.addf %3, %6 : vector<8x128xf32>
    %c0_6 = arith.constant 0 : index
    %c0_7 = arith.constant 0 : index
    %8 = vector.load %arg7[%c0_6, %c0_7] : memref<8x128xf32, #tpu.memory_space<vmem>>, vector<8x128xf32>
    tpu.vector_store %arg7[%c0_6, %c0_7], %7 {strides = array<i32>} : memref<8x128xf32, #tpu.memory_space<vmem>>, vector<8x128xf32>,
    %c0_i32_8 = arith.constant 0 : i32
    %9 = arith.cmpi eq, %arg2, %c0_i32_8 : i32
    %10 = arith.extui %9 : i1 to i32
    %c0_i32_9 = arith.constant 0 : i32
    %11 = arith.cmpi ne, %10, %c0_i32_9 : i32
    scf.if %11 {
      %c0_10 = arith.constant 0 : index
      %c0_11 = arith.constant 0 : index
      %12 = vector.load %arg7[%c0_10, %c0_11] : memref<8x128xf32, #tpu.memory_space<vmem>>, vector<8x128xf32>
      %c0_12 = arith.constant 0 : index
      %13 = memref.load %arg3[%c0_12] : memref<1xf32, #tpu.memory_space<smem>>
      %14 = vector.broadcast %13 : f32 to vector<8x128xf32>
      %15 = arith.addf %12, %14 : vector<8x128xf32>
      %c0_13 = arith.constant 0 : index
      %c0_14 = arith.constant 0 : index
      %16 = vector.load %arg6[%c0_13, %c0_14] : memref<8x128xf32, #tpu.memory_space<vmem>>, vector<8x128xf32>
      tpu.vector_store %arg6[%c0_13, %c0_14], %15 {strides = array<i32>} : memref<8x128xf32, #tpu.memory_space<vmem>>, vector<8x128xf32>,
    } else {
    }
    return
  }
  func.func @transform_0(%arg0: i32, %arg1: i32, %arg2: i32) -> i32 {
    %c0_i32 = arith.constant 0 : i32
    %c0_i32_0 = arith.constant 0 : i32
    return %c0_i32 : i32
  }
  func.func @transform_1(%arg0: i32, %arg1: i32, %arg2: i32) -> (i32, i32) {
    %c0_i32 = arith.constant 0 : i32
    return %arg0, %arg2 : i32, i32
  }
  func.func @transform_2(%arg0: i32, %arg1: i32, %arg2: i32) -> (i32, i32) {
    %c0_i32 = arith.constant 0 : i32
    return %arg2, %arg1 : i32, i32
  }
  func.func @transform_3(%arg0: i32, %arg1: i32, %arg2: i32) -> (i32, i32) {
    %c0_i32 = arith.constant 0 : i32
    return %arg0, %arg1 : i32, i32
  }
}

</mosaic_0001>

<bundles_post_ra>
// kernel: tpu_custom_call.1
= control target key start
LH: loop header
LB: loop body
LE: loop exit
PB: predicated region body
PF: predicated region fallthrough
CT: control target
= control target key end

     0   :  { %9 = vsyncpa [#allocation5], 0  ;;  %s237_s0 = inlined_call_operand.<no memory space> [shape: f32[1], index: 0, kind: input, shape index: {}]   ;;  %s238_s1 = inlined_call_operand.hbm [shape: f32[8,128], index: 1, kind: input, shape index: {}]   ;;  %s239_s2 = inlined_call_operand.hbm [shape: f32[128,128], index: 2, kind: input, shape index: {}]   ;;  %s240_s3 = inlined_call_operand.hbm [shape: f32[8,128], index: 3, kind: output, shape index: {}]  }
   0x1   :  { %10 = vsyncpa [#allocation8], 0 }
   0x2   :  { %11 = vsyncpa [#allocation6], 0  ;;  %s19_s14 = sshll.u32 %s238_s1, 4  ;;  %s200_s15 = smov [#allocation4]   ;;  %s20_s14 = int_to_ptr.hbm [resolvable:$true] %s19_s14 }
   0x3   :  { %s21_s16 = sshll.u32 %s200_s15, 4  ;;  %s29_s19 = sshll.u32 %s239_s2, 4  ;;  %s22_s16 = int_to_ptr.vmem [resolvable:$true] %s21_s16  ;;  %s30_s19 = int_to_ptr.hbm [resolvable:$true] %s29_s19 }
   0x4   :  { %24 = dma.hbm_to_vmem [thread:$0]  %s20_s14, 128, %s22_s16, [#allocation5]  }
   0x5   :  { %s201_s20 = smov [#allocation7]   ;;  %s202_s22 = smov 128  }
   0x6   :  { %s31_s21 = sshll.u32 %s201_s20, 4  ;;  %s203_s23 = smov 8   ;;  %s32_s21 = int_to_ptr.vmem [resolvable:$true] %s31_s21 }
   0x7   :  { %37 = dma.hbm_to_vmem [thread:$0]  %s30_s19, 2048, %s32_s21, [#allocation8], %s202_s22, %s202_s22, %s203_s23  }
   0x8   :  { %194 = dma.done.wait [#allocation5], 128  }
   0x9   :  { %195 = vsyncadd [#allocation5], 4294967168 }
   0xa   :  { %196 = dma.done.wait [#allocation8], 2048  }
   0xb   :  { %197 = vsyncadd [#allocation8], 4294965248  ;;  %v68_v0 = vld [vmem:[#allocation7 + $0x78] sm:$0xff]  ;;  %v67_v1 = vld [vmem:[#allocation7 + $0x70] sm:$0xff]  ;;  %v96_v17 = vstv %s237_s0  ;;  %s204_s24 = smov [#allocation9]   ;;  %s106_s28 = sshll.u32 %s240_s3, 4  ;;  %s107_s28 = int_to_ptr.hbm [resolvable:$true] %s106_s28 }
   0xc   :  { %69 = vmatpush.msra.mxu0 %v68_v0  ;;  %v66_v2 = vld [vmem:[#allocation7 + $0x68] sm:$0xff]  ;;  %v65_v3 = vld [vmem:[#allocation7 + $0x60] sm:$0xff]  ;;  %v64_v4 = vld [vmem:[#allocation7 + $0x58] sm:$0xff]  ;;  %s104_s25 = sshll.u32 %s204_s24, 4  ;;  %s105_s25 = int_to_ptr.vmem [resolvable:$true] %s104_s25 }
   0xd   :  { %v63_v5 = vld [vmem:[#allocation7 + $0x50] sm:$0xff]  ;;  %v62_v6 = vld [vmem:[#allocation7 + $0x48] sm:$0xff]  ;;  %v61_v7 = vld [vmem:[#allocation7 + $0x40] sm:$0xff] }
   0xe   :  { %70 = vmatpush.msra.mxu0 %v67_v1  ;;  %v60_v8 = vld [vmem:[#allocation7 + $0x38] sm:$0xff]  ;;  %v59_v9 = vld [vmem:[#allocation7 + $0x30] sm:$0xff]  ;;  %v58_v10 = vld [vmem:[#allocation7 + $0x28] sm:$0xff] }
   0xf   :  { %v57_v11 = vld [vmem:[#allocation7 + $0x20] sm:$0xff]  ;;  %v56_v12 = vld [vmem:[#allocation7 + $0x18] sm:$0xff]  ;;  %v55_v13 = vld [vmem:[#allocation7 + $0x10] sm:$0xff] }
  0x10   :  { %71 = vmatpush.msra.mxu0 %v66_v2  ;;  %v54_v14 = vld [vmem:[#allocation7 + $0x8] sm:$0xff]  ;;  %v53_v15 = vld [vmem:[#allocation7] sm:$0xff]  ;;  %v52_v16 = vld [vmem:[#allocation4] sm:$0xff] }
  0x12   :  { %72 = vmatpush.msra.mxu0 %v65_v3 }
  0x14   :  { %73 = vmatpush.msra.mxu0 %v64_v4 }
  0x16   :  { %74 = vmatpush.msra.mxu0 %v63_v5 }
  0x18   :  { %75 = vmatpush.msra.mxu0 %v62_v6 }
  0x1a   :  { %76 = vmatpush.msra.mxu0 %v61_v7 }
  0x1c   :  { %77 = vmatpush.msra.mxu0 %v60_v8 }
  0x1e   :  { %78 = vmatpush.msra.mxu0 %v59_v9 }
  0x20   :  { %79 = vmatpush.msra.mxu0 %v58_v10 }
  0x22   :  { %80 = vmatpush.msra.mxu0 %v57_v11 }
  0x24   :  { %81 = vmatpush.msra.mxu0 %v56_v12 }
  0x26   :  { %82 = vmatpush.msra.mxu0 %v55_v13 }
  0x28   :  { %83 = vmatpush.msra.mxu0 %v54_v14 }
  0x2a   :  { %84 = vmatpush.msra.mxu0 %v53_v15 }
  0x2b   :  { %85 = vmatmul.f32.vlgmr.msra.gmra.mxu0 %v52_v16 }
  0xa8   :  { %v86_v18 = vpop.f32.mrf.mxu0 }
  0xa9   :  { %v97_v19 = vadd.f32 %v96_v17, %v86_v18 }
  0xab   :  { %98 = vst [vmem:[#allocation9] sm:$0xff] %v97_v19 }
  0xac   :  { %109 = dma.vmem_to_hbm [thread:$0]  %s105_s25, 128, %s107_s28, [#allocation6]  }
  0xad   :  { %198 = dma.done.wait [#allocation6], 128  }
  0xae   :  { %199 = vsyncadd [#allocation6], 4294967168 }
  0xaf   :  { %114 = vsyncpa [#allocation5], 1 }
  0xb0   :  { %115 = vsyncpa [#allocation8], 1 }
  0xb1   :  { %116 = vsyncpa [#allocation6], 1 }

</bundles_post_ra>
